<compile_context>
chip_gen: v7x
topology: tpu7x:2x2x1
jax: 0.10.0
libtpu: 0.0.40
codegen_flags: <defaults>
</compile_context>

<pallas_src>
import jax
import jax.numpy as jnp
from jax.experimental import pallas as pl
from jax.experimental.pallas import tpu as pltpu


def _hbm_copy_kernel(x_ref, o_ref, sem):
    # Single direct HBM->HBM DMA; no VMEM round trip, no vector loads/stores.
    cp = pltpu.make_async_copy(x_ref, o_ref, sem)
    cp.start()
    cp.wait()


def _materialize_copy(x):
    """Bit-exact copy of `x` into a fresh buffer via one HBM->HBM DMA."""
    return pl.pallas_call(
        _hbm_copy_kernel,
        out_shape=jax.ShapeDtypeStruct(x.shape, x.dtype),
        in_specs=[pl.BlockSpec(memory_space=pl.ANY)],
        out_specs=pl.BlockSpec(memory_space=pl.ANY),
        scratch_shapes=[pltpu.SemaphoreType.DMA],
    )(x)


def unpack_features(x, output_dim, *, materialize=False):
    """x: (BSZ, B, L*D) -> (BSZ, B*L, D) with D = output_dim.

    rearrange('new_b b (l d) -> new_b (b l) d', d=output_dim) is a contiguous
    (row-major) reshape, so by default this function moves no data. Set
    materialize=True to force a fresh output buffer, produced by a single
    Pallas HBM->HBM DMA (useful only if a distinct buffer is truly required,
    e.g. for aliasing reasons or to fuse with downstream kernel work).
    """
    bsz, b, ld = x.shape
    assert ld % output_dim == 0, "input_dim must be divisible by output_dim"
    d = output_dim
    l = ld // d

    # The entire op. Metadata/relayout (if any) is left to XLA.
    y = x.reshape(bsz, b * l, d)
    if materialize:
        y = _materialize_copy(y)
    return y


if __name__ == "__main__":
    key = jax.random.PRNGKey(0)

    # Small shapes consistent with the module: BSZ=2, input_length=8,
    # input_dim=256, output_dim=64  ->  output (2, 32, 64).
    BSZ, B, D, L = 2, 8, 64, 4
    x = jax.random.normal(key, (BSZ, B, L * D), dtype=jnp.float32)

    ref = x.reshape(BSZ, B * L, D)

    # Default (recommended) path: free reshape, no kernel launched.
    out_fast = jax.block_until_ready(unpack_features(x, output_dim=D))
    assert out_fast.shape == (BSZ, B * L, D)
    assert out_fast.dtype == x.dtype
    assert jnp.array_equal(out_fast, ref)

    # Materialized path: exercises the Pallas HBM->HBM DMA copy kernel.
    out_kernel = jax.block_until_ready(
        unpack_features(x, output_dim=D, materialize=True)
    )
    assert out_kernel.shape == (BSZ, B * L, D)
    assert out_kernel.dtype == x.dtype
    assert jnp.array_equal(out_kernel, ref)

    print("KERNEL_OK")
</pallas_src>

<mosaic_0001>
module attributes {stable_mosaic.version = 11 : i64} {
  func.func @_hbm_copy_kernel(%arg0: memref<2x32x64xf32, #tpu.memory_space<any>>, %arg1: memref<2x32x64xf32, #tpu.memory_space<any>>, %arg2: memref<!tpu.dma_semaphore, #tpu.memory_space<semaphore_mem>>) attributes {dimension_semantics = [], scalar_prefetch = 0 : i64, scratch_operands = 1 : i64, tpu.core_type = #tpu.core_type<tc>} {
    tpu.enqueue_dma source(%arg0 : memref<2x32x64xf32, #tpu.memory_space<any>>) target(%arg1 : memref<2x32x64xf32, #tpu.memory_space<any>>) target_semaphore(%arg2 : memref<!tpu.dma_semaphore, #tpu.memory_space<semaphore_mem>>)
    tpu.wait_dma2 semaphore(%arg2 : memref<!tpu.dma_semaphore, #tpu.memory_space<semaphore_mem>>) src(%arg0 : memref<2x32x64xf32, #tpu.memory_space<any>>) dst(%arg1 : memref<2x32x64xf32, #tpu.memory_space<any>>)
    return
  }
}

</mosaic_0001>

<bundles_post_ra>
// kernel: tpu_custom_call.1
= control target key start
LH: loop header
LB: loop body
LE: loop exit
PB: predicated region body
PF: predicated region fallthrough
CT: control target
= control target key end

     0   :  { %s35_s6 = smov [#allocation2]   ;;  %s36_s7 = smov [#allocation3]   ;;  %s54_s0 = inlined_call_operand.hbm [shape: f32[2,32,64], index: 0, kind: input, shape index: {}]   ;;  %s55_s1 = inlined_call_operand.hbm [shape: f32[2,32,64], index: 1, kind: output, shape index: {}]  }
   0x1   :  { %s37_s8 = smov 0  }
   0x2   :  { %18 = dma.general %s54_s0, 1024, %s55_s1, %s35_s6, %s36_s7, [#allocation4], %s37_s8, 0  }
   0x3   :  { %33 = dma.done.wait [#allocation2], 1024 }
   0x4   :  { %34 = vsyncadd [#allocation2], 4294966272 }
   0x5   :  { %23 = vsyncmov [#allocation2] }
   0x8   :  { %s24_s13 = vpop.sfrf %23 }
   0x9   :  { %p29_p0 = scmp.ne.s32.totalorder %s24_s13, 0 }
   0xb   :  { %28 = shalt.err (%p29_p0)  }

</bundles_post_ra>
